<compile_context>
chip_gen: v7x
topology: tpu7x:2x2x1
jax: 0.10.0
libtpu: 0.0.40
codegen_flags: <defaults>
</compile_context>

<pallas_src>
import jax
import jax.numpy as jnp
from jax.experimental import pallas as pl
from jax.experimental.pallas import tpu as pltpu


def lraspp_head_kernel(high_ref, w_cbr_t_ref, scale_ref, bias_ref,
                       w_cls_t_ref, b_cls_ref, out_ref):
    """One grid step = one (batch, HW-tile) pair, NCHW-native layout.

    high_ref   : (C_high, TILE_HW)      f32   channels on sublanes, pixels on lanes
    w_cbr_t_ref: (C_inter, C_high)      bf16
    scale_ref  : (C_inter, 1)           f32   folded BN scale * sigmoid gate (per batch)
    bias_ref   : (C_inter, 1)           f32   folded BN bias  * sigmoid gate (per batch)
    w_cls_t_ref: (num_classes, C_inter) bf16
    b_cls_ref  : (num_classes, 1)       f32
    out_ref    : (num_classes, TILE_HW) f32
    """
    # Cast the f32 tile to bf16 on-chip (avoids a separate HBM cast pass).
    h = high_ref[...].astype(jnp.bfloat16)

    # cbr branch: 1x1 conv (no bias) -> (C_inter, TILE_HW), f32 accumulation.
    y = jnp.dot(w_cbr_t_ref[...], h, preferred_element_type=jnp.float32)

    # Folded eval-mode BatchNorm with the sigmoid gate pre-multiplied in
    # (gate > 0, so the fold commutes with ReLU), then ReLU.
    y = jnp.maximum(y * scale_ref[...] + bias_ref[...], 0.0)

    # high_classifier: 1x1 conv with bias -> (num_classes, TILE_HW).
    out = jnp.dot(w_cls_t_ref[...], y.astype(jnp.bfloat16),
                  preferred_element_type=jnp.float32) + b_cls_ref[...]
    out_ref[...] = out.astype(out_ref.dtype)


def _choose_tile_hw(hw):
    """Lane-dense HW tile: full HW for small images, else a large divisor."""
    cap = 1024  # amortizes per-grid-step overhead; fits VMEM on v5e/v6e/v7x
    if hw <= cap:
        return hw  # single full-extent tile (always a legal block shape)
    for t in (1024, 896, 768, 640, 512, 384, 256, 128):
        if hw % t == 0:
            return t
    return cap  # non-divisible edge case -> padded below


def prepare_params(raw, eps=1e-5):
    """One-time parameter prep, hoisted out of the per-step forward.

    PyTorch 1x1 conv weights are (Cout, Cin, 1, 1); `raw` stores them as
    (Cin, Cout).  Here we transpose to (Cout, Cin) matmul operands, cast the
    MXU weights to bf16 and fold BatchNorm (eval mode) into scale/bias.
    """
    bn_scale = raw["bn_gamma"] / jnp.sqrt(raw["bn_var"] + eps)
    bn_bias = raw["bn_beta"] - raw["bn_mean"] * bn_scale
    num_classes = raw["w_cls"].shape[1]
    return {
        "w_cbr_t": raw["w_cbr"].T.astype(jnp.bfloat16),            # (C_inter, C_high)
        "w_scale": raw["w_scale"].astype(jnp.float32),             # (C_high, C_inter)
        "w_cls_t": raw["w_cls"].T.astype(jnp.bfloat16),            # (num_classes, C_inter)
        "b_cls_col": raw["b_cls"].reshape(num_classes, 1).astype(jnp.float32),
        "bn_scale": bn_scale.astype(jnp.float32),                  # (C_inter,)
        "bn_bias": bn_bias.astype(jnp.float32),                    # (C_inter,)
    }


def lraspp_head_forward(high_nchw, params):
    """high_nchw: (N, C_high, H, W) float32. Returns (N, num_classes, H, W)."""
    N, C_high, H, W = high_nchw.shape
    HW = H * W
    C_inter = params["w_cbr_t"].shape[0]
    num_classes = params["w_cls_t"].shape[0]

    # NCHW-native flattened view: free reshape, no transpose pass.
    high_flat = high_nchw.reshape(N, C_high, HW)

    # --- scale branch (hoisted): AdaptiveAvgPool2d(1) + 1x1 conv + sigmoid ---
    pooled = jnp.mean(high_nchw, axis=(2, 3))                        # (N, C_high)
    gate = jax.nn.sigmoid(pooled @ params["w_scale"])                # (N, C_inter)
    # Fold the strictly-positive gate into the folded-BN affine (per batch).
    fused_scale = (params["bn_scale"][None, :] * gate).reshape(N, C_inter, 1)
    fused_bias = (params["bn_bias"][None, :] * gate).reshape(N, C_inter, 1)
    fused_scale = fused_scale.astype(jnp.float32)
    fused_bias = fused_bias.astype(jnp.float32)

    # --- HW tiling (pad only if no clean divisor exists) ---------------------
    TILE_HW = _choose_tile_hw(HW)
    HW_pad = pl.cdiv(HW, TILE_HW) * TILE_HW
    if HW_pad != HW:
        high_flat = jnp.pad(high_flat, ((0, 0), (0, 0), (0, HW_pad - HW)))
    n_hw_tiles = HW_pad // TILE_HW

    # --- cost / VMEM accounting ----------------------------------------------
    flops = (2 * N * HW_pad * C_high * C_inter
             + 2 * N * HW_pad * C_inter * num_classes)
    bytes_accessed = (N * HW_pad * C_high * 4            # f32 input read
                      + N * HW_pad * num_classes * 4     # f32 output write
                      + C_inter * C_high * 2 + num_classes * C_inter * 2
                      + N * C_inter * 8 + num_classes * 4)
    cost = pl.CostEstimate(flops=flops, transcendentals=0,
                           bytes_accessed=bytes_accessed)

    # Double-buffered input/output tiles + resident weights, with headroom.
    tile_bytes = (2 * C_high * TILE_HW * 4
                  + 2 * num_classes * TILE_HW * 4
                  + 2 * (C_inter * C_high * 2 + num_classes * C_inter * 2)
                  + 2 * (2 * C_inter + num_classes) * 4)
    vmem_limit = min(max(2 * tile_bytes + (2 << 20), 16 << 20), 64 << 20)

    out_flat = pl.pallas_call(
        lraspp_head_kernel,
        out_shape=jax.ShapeDtypeStruct((N, num_classes, HW_pad), jnp.float32),
        grid_spec=pltpu.PrefetchScalarGridSpec(
            num_scalar_prefetch=0,
            grid=(N, n_hw_tiles),
            in_specs=[
                # activations: squeezed batch dim, full channels, tiled HW
                pl.BlockSpec((None, C_high, TILE_HW), lambda n, t: (n, 0, t)),
                pl.BlockSpec((C_inter, C_high), lambda n, t: (0, 0)),
                # per-batch fused (BN * gate) scale / bias column vectors
                pl.BlockSpec((None, C_inter, 1), lambda n, t: (n, 0, 0)),
                pl.BlockSpec((None, C_inter, 1), lambda n, t: (n, 0, 0)),
                pl.BlockSpec((num_classes, C_inter), lambda n, t: (0, 0)),
                pl.BlockSpec((num_classes, 1), lambda n, t: (0, 0)),
            ],
            out_specs=pl.BlockSpec((None, num_classes, TILE_HW),
                                   lambda n, t: (n, 0, t)),
        ),
        compiler_params=pltpu.CompilerParams(
            dimension_semantics=("parallel", "parallel"),
            vmem_limit_bytes=vmem_limit),
        cost_estimate=cost,
    )(high_flat, params["w_cbr_t"], fused_scale, fused_bias,
      params["w_cls_t"], params["b_cls_col"])

    if HW_pad != HW:
        out_flat = out_flat[:, :, :HW]
    return out_flat.reshape(N, num_classes, H, W)   # already NCHW — free reshape


def init_params(key, low_channels, high_channels, num_classes, inter_channels):
    """Deterministic synthetic parameters matching LRASPPHead.__init__ shapes.

    PyTorch 1x1 conv weights are (Cout, Cin, 1, 1); stored here transposed as
    (Cin, Cout) matmul operands.  low_classifier (Conv2d(low_channels,
    num_classes, 1, stride=2)) is defined in __init__ but never used in
    forward; omitted from compute.
    """
    ks = jax.random.split(key, 6)
    return {
        # cbr: Conv2d(high_channels, inter_channels, 1, bias=False) + BN
        "w_cbr": 0.1 * jax.random.normal(ks[0], (high_channels, inter_channels),
                                         jnp.float32),
        "bn_gamma": jnp.ones((inter_channels,), jnp.float32)
                    + 0.05 * jax.random.normal(ks[1], (inter_channels,), jnp.float32),
        "bn_beta": 0.05 * jax.random.normal(ks[2], (inter_channels,), jnp.float32),
        "bn_mean": 0.1 * jax.random.normal(ks[3], (inter_channels,), jnp.float32),
        "bn_var": jnp.ones((inter_channels,), jnp.float32),
        # scale: Conv2d(high_channels, inter_channels, 1, bias=False)
        "w_scale": 0.1 * jax.random.normal(ks[4], (high_channels, inter_channels),
                                           jnp.float32),
        # high_classifier: Conv2d(inter_channels, num_classes, 1) with bias
        "w_cls": 0.1 * jax.random.normal(ks[5], (inter_channels, num_classes),
                                         jnp.float32),
        "b_cls": jnp.linspace(-0.1, 0.1, num_classes).astype(jnp.float32),
    }


def _reference_forward(high_nchw, raw_params):
    """Pure-JAX f32 reference of the eval-mode PyTorch forward."""
    h = jnp.transpose(high_nchw, (0, 2, 3, 1))                       # NHWC
    eps = 1e-5
    bn_scale = raw_params["bn_gamma"] / jnp.sqrt(raw_params["bn_var"] + eps)
    bn_bias = raw_params["bn_beta"] - raw_params["bn_mean"] * bn_scale
    y = jnp.maximum(jnp.einsum("nhwc,co->nhwo", h, raw_params["w_cbr"])
                    * bn_scale + bn_bias, 0.0)
    pooled = jnp.mean(h, axis=(1, 2), keepdims=True)
    s = jax.nn.sigmoid(jnp.einsum("nhwc,co->nhwo", pooled, raw_params["w_scale"]))
    out = (jnp.einsum("nhwc,co->nhwo", y * s, raw_params["w_cls"])
           + raw_params["b_cls"])
    return jnp.transpose(out, (0, 3, 1, 2))


if __name__ == "__main__":
    # Small, forward-consistent shapes.
    N = 2
    low_channels = 8
    high_channels = 8
    inter_channels = 32
    num_classes = 4
    H = W = 16

    key = jax.random.PRNGKey(0)
    k_low, k_high, k_params = jax.random.split(key, 3)

    # Module takes a dict {'low': ..., 'high': ...}; `low` is unused by forward.
    inputs = {
        "low": jax.random.normal(k_low, (N, low_channels, 2 * H, 2 * W), jnp.float32),
        "high": jax.random.normal(k_high, (N, high_channels, H, W), jnp.float32),
    }

    raw_params = init_params(k_params, low_channels, high_channels,
                             num_classes, inter_channels)
    params = prepare_params(raw_params)           # one-time prep, outside forward

    forward = jax.jit(lraspp_head_forward)
    out = jax.block_until_ready(forward(inputs["high"], params))
    assert out.shape == (N, num_classes, H, W), out.shape

    # Sanity check against the pure-JAX reference (bf16 matmuls -> loose tol).
    ref = jax.block_until_ready(_reference_forward(inputs["high"], raw_params))
    max_err = float(jnp.max(jnp.abs(out - ref)))
    assert max_err < 5e-2, max_err

    print("KERNEL_OK")
</pallas_src>

<mosaic_0001>
module attributes {stable_mosaic.version = 11 : i64} {
  func.func @lraspp_head_kernel(%arg0: i32, %arg1: i32, %arg2: memref<1x8x256xf32, #tpu.memory_space<vmem>>, %arg3: memref<32x8xbf16, #tpu.memory_space<vmem>>, %arg4: memref<1x32x1xf32, #tpu.memory_space<vmem>>, %arg5: memref<1x32x1xf32, #tpu.memory_space<vmem>>, %arg6: memref<4x32xbf16, #tpu.memory_space<vmem>>, %arg7: memref<4x1xf32, #tpu.memory_space<vmem>>, %arg8: memref<1x4x256xf32, #tpu.memory_space<vmem>>) attributes {dimension_semantics = [#tpu.dimension_semantics<parallel>, #tpu.dimension_semantics<parallel>], iteration_bounds = array<i64: 2, 1>, scalar_prefetch = 0 : i64, scratch_operands = 0 : i64, tpu.core_type = #tpu.core_type<tc>, window_params = [{transform_indices = @transform_0, window_bounds = array<i64: 1, 8, 256>}, {pipeline_mode = #tpu.pipeline_mode<synchronous>, transform_indices = @transform_1, window_bounds = array<i64: 32, 8>}, {transform_indices = @transform_2, window_bounds = array<i64: 1, 32, 1>}, {transform_indices = @transform_3, window_bounds = array<i64: 1, 32, 1>}, {pipeline_mode = #tpu.pipeline_mode<synchronous>, transform_indices = @transform_4, window_bounds = array<i64: 4, 32>}, {pipeline_mode = #tpu.pipeline_mode<synchronous>, transform_indices = @transform_5, window_bounds = array<i64: 4, 1>}, {transform_indices = @transform_6, window_bounds = array<i64: 1, 4, 256>}]} {
    %c0 = arith.constant 0 : index
    %c0_0 = arith.constant 0 : index
    %c0_1 = arith.constant 0 : index
    %0 = vector.load %arg2[%c0, %c0_0, %c0_1] : memref<1x8x256xf32, #tpu.memory_space<vmem>>, vector<1x8x256xf32>
    %1 = vector.shape_cast %0 : vector<1x8x256xf32> to vector<8x256xf32>
    %2 = arith.truncf %1 : vector<8x256xf32> to vector<8x256xbf16>
    %c0_2 = arith.constant 0 : index
    %c0_3 = arith.constant 0 : index
    %3 = vector.load %arg3[%c0_2, %c0_3] : memref<32x8xbf16, #tpu.memory_space<vmem>>, vector<32x8xbf16>
    %cst = arith.constant dense<0.000000e+00> : vector<32x256xf32>
    %4 = tpu.matmul %3, %2, %cst {dimension_numbers = #tpu.dot_dimension_numbers<[1], [0], [0], [1], [0, 0, 1, 1], [], []>} : vector<32x8xbf16>, vector<8x256xbf16>, vector<32x256xf32> -> vector<32x256xf32>
    %c0_4 = arith.constant 0 : index
    %c0_5 = arith.constant 0 : index
    %c0_6 = arith.constant 0 : index
    %5 = vector.load %arg4[%c0_4, %c0_5, %c0_6] : memref<1x32x1xf32, #tpu.memory_space<vmem>>, vector<1x32x1xf32>
    %6 = vector.shape_cast %5 : vector<1x32x1xf32> to vector<32x1xf32>
    %7 = vector.broadcast %6 : vector<32x1xf32> to vector<32x256xf32>
    %8 = arith.mulf %4, %7 : vector<32x256xf32>
    %c0_7 = arith.constant 0 : index
    %c0_8 = arith.constant 0 : index
    %c0_9 = arith.constant 0 : index
    %9 = vector.load %arg5[%c0_7, %c0_8, %c0_9] : memref<1x32x1xf32, #tpu.memory_space<vmem>>, vector<1x32x1xf32>
    %10 = vector.shape_cast %9 : vector<1x32x1xf32> to vector<32x1xf32>
    %11 = vector.broadcast %10 : vector<32x1xf32> to vector<32x256xf32>
    %12 = arith.addf %8, %11 : vector<32x256xf32>
    %cst_10 = arith.constant 0.000000e+00 : f32
    %13 = vector.broadcast %cst_10 : f32 to vector<32x256xf32>
    %14 = arith.maximumf %12, %13 : vector<32x256xf32>
    %c0_11 = arith.constant 0 : index
    %c0_12 = arith.constant 0 : index
    %15 = vector.load %arg6[%c0_11, %c0_12] : memref<4x32xbf16, #tpu.memory_space<vmem>>, vector<4x32xbf16>
    %16 = arith.truncf %14 : vector<32x256xf32> to vector<32x256xbf16>
    %cst_13 = arith.constant dense<0.000000e+00> : vector<4x256xf32>
    %17 = tpu.matmul %15, %16, %cst_13 {dimension_numbers = #tpu.dot_dimension_numbers<[1], [0], [0], [1], [0, 0, 1, 1], [], []>} : vector<4x32xbf16>, vector<32x256xbf16>, vector<4x256xf32> -> vector<4x256xf32>
    %c0_14 = arith.constant 0 : index
    %c0_15 = arith.constant 0 : index
    %18 = vector.load %arg7[%c0_14, %c0_15] : memref<4x1xf32, #tpu.memory_space<vmem>>, vector<4x1xf32>
    %19 = vector.broadcast %18 : vector<4x1xf32> to vector<4x256xf32>
    %20 = arith.addf %17, %19 : vector<4x256xf32>
    %c0_16 = arith.constant 0 : index
    %c0_17 = arith.constant 0 : index
    %c0_18 = arith.constant 0 : index
    %21 = vector.load %arg8[%c0_16, %c0_17, %c0_18] : memref<1x4x256xf32, #tpu.memory_space<vmem>>, vector<1x4x256xf32>
    %22 = vector.shape_cast %21 : vector<1x4x256xf32> to vector<4x256xf32>
    %23 = vector.shape_cast %20 : vector<4x256xf32> to vector<1x4x256xf32>
    tpu.vector_store %arg8[%c0_16, %c0_17, %c0_18], %23 {strides = array<i32>} : memref<1x4x256xf32, #tpu.memory_space<vmem>>, vector<1x4x256xf32>,
    return
  }
  func.func @transform_0(%arg0: i32, %arg1: i32) -> (i32, i32, i32) {
    %c0_i32 = arith.constant 0 : i32
    %c0_i32_0 = arith.constant 0 : i32
    return %arg0, %c0_i32, %arg1 : i32, i32, i32
  }
  func.func @transform_1(%arg0: i32, %arg1: i32) -> (i32, i32) {
    %c0_i32 = arith.constant 0 : i32
    %c0_i32_0 = arith.constant 0 : i32
    %c0_i32_1 = arith.constant 0 : i32
    return %c0_i32, %c0_i32_0 : i32, i32
  }
  func.func @transform_2(%arg0: i32, %arg1: i32) -> (i32, i32, i32) {
    %c0_i32 = arith.constant 0 : i32
    %c0_i32_0 = arith.constant 0 : i32
    %c0_i32_1 = arith.constant 0 : i32
    return %arg0, %c0_i32, %c0_i32_0 : i32, i32, i32
  }
  func.func @transform_3(%arg0: i32, %arg1: i32) -> (i32, i32, i32) {
    %c0_i32 = arith.constant 0 : i32
    %c0_i32_0 = arith.constant 0 : i32
    %c0_i32_1 = arith.constant 0 : i32
    return %arg0, %c0_i32, %c0_i32_0 : i32, i32, i32
  }
  func.func @transform_4(%arg0: i32, %arg1: i32) -> (i32, i32) {
    %c0_i32 = arith.constant 0 : i32
    %c0_i32_0 = arith.constant 0 : i32
    %c0_i32_1 = arith.constant 0 : i32
    return %c0_i32, %c0_i32_0 : i32, i32
  }
  func.func @transform_5(%arg0: i32, %arg1: i32) -> (i32, i32) {
    %c0_i32 = arith.constant 0 : i32
    %c0_i32_0 = arith.constant 0 : i32
    %c0_i32_1 = arith.constant 0 : i32
    return %c0_i32, %c0_i32_0 : i32, i32
  }
  func.func @transform_6(%arg0: i32, %arg1: i32) -> (i32, i32, i32) {
    %c0_i32 = arith.constant 0 : i32
    %c0_i32_0 = arith.constant 0 : i32
    return %arg0, %c0_i32, %arg1 : i32, i32, i32
  }
}

</mosaic_0001>

<bundles_post_ra>
// kernel: lraspp_head_forward.1
= control target key start
LH: loop header
LB: loop body
LE: loop exit
PB: predicated region body
PF: predicated region fallthrough
CT: control target
= control target key end

     0   :  { %s775_s21 = smov 0   ;;  %s777_s22 = smov 0   ;;  %s831_s0 = inlined_call_operand.vmem [shape: f32[2,8,256], index: 0, kind: input, shape index: {}]   ;;  %s832_s1 = inlined_call_operand.vmem [shape: bf16[32,8], index: 1, kind: input, shape index: {}]   ;;  %s833_s2 = inlined_call_operand.vmem [shape: f32[2,32,1], index: 2, kind: input, shape index: {}]   ;;  %s834_s3 = inlined_call_operand.vmem [shape: f32[2,32,1], index: 3, kind: input, shape index: {}]   ;;  %s835_s4 = inlined_call_operand.vmem [shape: bf16[4,32], index: 4, kind: input, shape index: {}]   ;;  %s836_s5 = inlined_call_operand.vmem [shape: f32[4,1], index: 5, kind: input, shape index: {}]   ;;  %s837_s6 = inlined_call_operand.vmem [shape: f32[2,4,256], index: 6, kind: output, shape index: {}]  }
   0x1   :  { %s779_s23 = smov 0  }
   0x2 LB: > { %s28_s24 = sadd.s32 1, %s733_s22  ;;  %p665_p0 = scmp.ge.s32.totalorder %s737_s23, 1  ;;  %s737_s23 = sphi %s779_s23, %s16_s23   ;;  %s733_s22 = sphi %s777_s22, %s839_s22   ;;  %s729_s21 = sphi %s775_s21, %s838_s21  }
   0x3   : > { %p30_p1 = scmp.ge.s32.totalorder %s28_s24, 2  ;;  %p253_p2 = scmp.lt.s32.totalorder %s737_s23, 3 }
   0x5   : > { %s841_s24 = smov (%p30_p1, %s28_s24), 0  ;;  %p254_p3 = pnand %p665_p0, %p253_p2 }
   0x6   : > { %p302_p4 = scmp.lt.s32.totalorder (!%p254_p3), %s729_s21, 1  ;;  %v739_v0 = vmov (!%p254_p3), 0   ;;  %vm357_vm0 = vcmask (!%p254_p3), 1043456   ;;  %v713_v9 = vld [vmem:[%s832_s1] sm:$0xff] (!%p254_p3)   ;;  %vm350_vm1 = vcmask (!%p254_p3), 64512   ;;  %v714_v14 = vld [vmem:[%s832_s1 + $0x8] sm:$0xff] (!%p254_p3)  }
   0x7   : > { %257 = sbr.rel (%p254_p3) target bundleno = 477 (0x1dd), region = 44  ;;  %396 = vmatprep.mubr.bf16.mxu0 (!%p254_p3), %v739_v0  ;;  %711 = vset.pattern.permute.xlu0 (!%p254_p3), %v739_v0  ;;  %v494_v16 = vld [vmem:[%s836_s5] sm:$0xf] (!%p254_p3)  ;;  %vm500_vm2 = vcmask (!%p254_p3), 261120  }
   0x8   : > { %712 = vset.pattern.permute.xlu1 (!%p254_p3), %v739_v0  ;;  %536 = vmatprep.mubr.bf16.mxu1 (!%p254_p3), %v739_v0  ;;  %v489_v61 = vld [vmem:[%s835_s4] sm:$0x3] (!%p254_p3) }
   0xe   : > { %s843_s21 = smov (!%p302_p4, %s729_s21), 1 }
   0xf   : > { %s682_s25 = sshll.u32 %s843_s21, 4  ;;  %s683_s26 = sshll.u32 %s843_s21, 5 }
  0x10   : > { %s309_s29 = scalar_lea.vmem %s831_s0, %s682_s25  ;;  %s315_s8 = scalar_lea.vmem %s833_s2, %s683_s26 }
  0x11   : > { %v333_v1 = vld [vmem:[%s309_s29 + $0x8] sm:$0xff]  ;;  %v332_v2 = vld [vmem:[%s309_s29] sm:$0xff]  ;;  %s320_s11 = scalar_lea.vmem %s834_s3, %s683_s26  ;;  %v419_v11 = vld [vmem:[%s315_s8 + $0x10] sm:$0xff]  ;;  %s685_s20 = sshll.u32 %s843_s21, 3 }
  0x12   : > { %v417_v3 = vld [vmem:[%s315_s8] sm:$0xff]  ;;  %v335_v4 = vpack.c.bf16 %v333_v1, %v333_v1  ;;  %v334_v5 = vpack.c.bf16 %v332_v2, %v332_v2  ;;  %v418_v7 = vld [vmem:[%s315_s8 + $0x8] sm:$0xff]  ;;  %v420_v12 = vld [vmem:[%s315_s8 + $0x18] sm:$0xff]  ;;  %s329_s27 = scalar_lea.vmem %s837_s6, %s685_s20 }
  0x13   : > { %423 = vperm.xlu0 %711, %v417_v3   ;;  %v449_v6 = vld [vmem:[%s320_s11] sm:$0xff]  ;;  %v450_v10 = vld [vmem:[%s320_s11 + $0x8] sm:$0xff]  ;;  %v451_v13 = vld [vmem:[%s320_s11 + $0x10] sm:$0xff] }
  0x14   : > { %455 = vperm.xlu1 %712, %v449_v6   ;;  %676 = vmatprep.subr.msk.bf16.mxu0 %vm357_vm0, %v335_v4  ;;  %v359_v8 = vsel %vm357_vm0, %v334_v5, 0  ;;  %v452_v15 = vld [vmem:[%s320_s11 + $0x18] sm:$0xff] }
  0x15   : > { %365 = vmatpush1.bf16.msra.mxu0 %v359_v8 }
  0x17   : > { %428 = vperm.xlu0 %711, %v418_v7  }
  0x18   : > { %460 = vperm.xlu1 %712, %v450_v10   ;;  %677 = vmatmul.mubr.msk.bf16.vlgmr.msra.gmra.mrb[0].mxu0 %vm350_vm1, %v713_v9 }
  0x19   : > { %406 = vmatprep.mubr.bf16.mxu0 %v739_v0 }
  0x1b   : > { %433 = vperm.xlu0 %711, %v419_v11  }
  0x1c   : > { %438 = vperm.xlu1 %712, %v420_v12  }
  0x1f   : > { %465 = vperm.xlu0 %711, %v451_v13  }
  0x20   : > { %470 = vperm.xlu1 %712, %v452_v15   ;;  %678 = vmatmul.mubr.msk.bf16.gmra.mrb[4].mxu0 %vm350_vm1, %v714_v14 }
  0x23   : > { %497 = vperm.xlu0 %711, %v494_v16  }
  0x92   : > { %v424_v17 = vpop.permute.xlu0 %423 }
  0x93   : > { %v456_v18 = vpop.permute.xlu1 %455 }
  0x96   : > { %v429_v19 = vpop.permute.xlu0 %428 }
  0x97   : > { %v461_v20 = vpop.permute.xlu1 %460 }
  0x9a   : > { %v434_v29 = vpop.permute.xlu0 %433 }
  0x9b   : > { %v439_v33 = vpop.permute.xlu1 %438 }
  0x9e   : > { %v466_v43 = vpop.permute.xlu0 %465 }
  0x9f   : > { %v471_v50 = vpop.permute.xlu1 %470 }
  0xa2   : > { %v498_v62 = vpop.permute.xlu0 %497 }
  0xeb   : > { %v398_v21 = vpop.f32.mrb[0].mxu0 }
  0xec   : > { %v441_v22 = vmul.f32 %v424_v17, %v398_v21  ;;  %v400_v23 = vpop.f32.mrb[1].mxu0 }
  0xed   : > { %v442_v24 = vmul.f32 %v424_v17, %v400_v23  ;;  %v402_v25 = vpop.f32.mrb[2].mxu0 }
  0xee   : > { %v473_v26 = vadd.f32 %v456_v18, %v441_v22  ;;  %v443_v27 = vmul.f32 %v429_v19, %v402_v25  ;;  %v404_v28 = vpop.f32.mrb[3].mxu0 }
  0xef   : > { %v444_v30 = vmul.f32 %v429_v19, %v404_v28  ;;  %v474_v31 = vadd.f32 %v456_v18, %v442_v24 }
  0xf0   : > { %v475_v32 = vadd.f32 %v461_v20, %v443_v27  ;;  %v481_v35 = vmax.f32 %v473_v26, 0.0 }
  0xf1   : > { %v476_v34 = vadd.f32 %v461_v20, %v444_v30  ;;  %v482_v38 = vmax.f32 %v474_v31, 0.0 }
  0xf2   : > { %v483_v36 = vmax.f32 %v475_v32, 0.0 }
  0xf3   : > { %v408_v37 = vpop.f32.mrb[4].mxu0  ;;  %v484_v39 = vmax.f32 %v476_v34, 0.0 }
  0xf4   : > { %v445_v40 = vmul.f32 %v434_v29, %v408_v37  ;;  %v410_v41 = vpop.f32.mrb[5].mxu0  ;;  %v490_v42 = vpack.c.bf16 %v483_v36, %v481_v35 }
  0xf5   : > { %v446_v44 = vmul.f32 %v434_v29, %v410_v41  ;;  %v412_v45 = vpop.f32.mrb[6].mxu0  ;;  %v491_v46 = vpack.c.bf16 %v484_v39, %v482_v38 }
  0xf6   : > { %v477_v47 = vadd.f32 %v466_v43, %v445_v40  ;;  %v447_v48 = vmul.f32 %v439_v33, %v412_v45  ;;  %v414_v49 = vpop.f32.mrb[7].mxu0 }
  0xf7   : > { %v478_v51 = vadd.f32 %v466_v43, %v446_v44  ;;  %v448_v52 = vmul.f32 %v439_v33, %v414_v49  ;;  %504 = vmatprep.subr.bf16.mxu1 %v491_v46 }
  0xf8   : > { %v479_v53 = vadd.f32 %v471_v50, %v447_v48  ;;  %505 = vmatpush1.bf16.msra.mxu1 %v490_v42  ;;  %v485_v55 = vmax.f32 %v477_v47, 0.0 }
  0xf9   : > { %v480_v54 = vadd.f32 %v471_v50, %v448_v52  ;;  %v486_v57 = vmax.f32 %v478_v51, 0.0 }
  0xfa   : > { %v487_v56 = vmax.f32 %v479_v53, 0.0 }
  0xfb   : > { %v488_v58 = vmax.f32 %v480_v54, 0.0 }
  0xfc   : > { %v492_v59 = vpack.c.bf16 %v487_v56, %v485_v55 }
  0xfd   : > { %v493_v60 = vpack.c.bf16 %v488_v58, %v486_v57 }
  0xff   : > { %506 = vmatprep.subr.bf16.mxu1 %v493_v60 }
 0x100   : > { %507 = vmatpush1.bf16.msra.mxu1 %v492_v59 }
 0x103   : > { %679 = vmatmul.mubr.msk.bf16.vlgmr.msra.gmra.mrb[0].mxu1 %vm500_vm2, %v489_v61 }
 0x1d6   : > { %v538_v63 = vpop.f32.mrb[0].mxu1 }
 0x1d7   : > { %v539_v0 = vadd.f32 %v538_v63, %v498_v62  ;;  %v540_v1 = vpop.f32.mrb[1].mxu1 }
 0x1d8   : > { %v541_v2 = vadd.f32 %v540_v1, %v498_v62  ;;  %v542_v3 = vpop.f32.mrb[2].mxu1 }
 0x1d9   : > { %v543_v4 = vpop.f32.mrb[3].mxu1 }
 0x1da   : > { %v547_v5 = vcombine.low %v539_v0, %v541_v2 }
 0x1dc   : > { %549 = vst [vmem:[%s329_s27] sm:$0xff] %v547_v5 }
 0x1dd PF: > { %s16_s23 = sadd.s32 1, %s737_s23   ;;  %s838_s21 = smov %s733_s22 }
 0x1de   : > { %p13_p5 = scmp.ge.s32.totalorder %s16_s23, 4   ;;  %s839_s22 = smov %s841_s24 }
 0x1e0   :  { %15 = sbr.rel (!%p13_p5) target bundleno = 2 (0x2), region = 80 }

</bundles_post_ra>
